<compile_context>
chip_gen: v5e
topology: v5e:2x2
jax: 0.10.0
libtpu: 0.0.40
codegen_flags: <defaults>
</compile_context>

<pallas_src>
import jax
import jax.numpy as jnp
from jax.experimental import pallas as pl
from jax.experimental.pallas import tpu as pltpu


def _round_up(x, m):
  return ((x + m - 1) // m) * m


def decoder_step_kernel(
    emb_ref, h_ref, enc_ref, mask_ref,
    wa_h_ref, wa_e_ref, ba_ref, v_ref,
    wi_e_ref, wi_c_ref, wh_ref, bi_ref, bh_ref,
    wf_e_ref, wf_c_ref, wf_h_ref, bfc_ref,
    out_ref, hnew_ref, attn_ref,
    ctx_sc, hn_sc):
  f32 = jnp.float32
  H = hnew_ref.shape[-1]

  # Attention + GRU depend only on the batch tile; compute once per batch tile
  # (vocab axis j is the inner, "arbitrary" grid axis) and cache in scratch.
  @pl.when(pl.program_id(1) == 0)
  def _attention_and_gru():
    emb = emb_ref[...]                 # (TB, De)
    h = h_ref[...]                     # (TB, H)
    enc = enc_ref[...]                 # (TB, S, E2)
    msk = mask_ref[...]                # (TB, S)
    TB, S, E2 = enc.shape

    # ----- Bahdanau attention (concat-free, batch folded into sublanes) -----
    hW = jnp.dot(h, wa_h_ref[...], preferred_element_type=f32)        # (TB, H)
    eW = jnp.dot(enc.reshape(TB * S, E2), wa_e_ref[...],
                 preferred_element_type=f32).reshape(TB, S, H)        # (TB, S, H)
    energy = jnp.tanh(hW[:, None, :] + eW + ba_ref[...])              # (TB, S, H)
    # score[b, s] = v . energy[b, s, :]  -> VPU multiply + XLU lane reduction
    score = jnp.sum(energy * v_ref[...], axis=-1)                     # (TB, S)
    score = jnp.where(msk == 0.0, -1e10, score)
    m = jnp.max(score, axis=-1, keepdims=True)
    e = jnp.exp(score - m)
    inv = pl.reciprocal(jnp.sum(e, axis=-1, keepdims=True), approx=True)
    attn_w = e * inv                                                  # (TB, S)
    attn_ref[...] = attn_w.astype(attn_ref.dtype)
    ctx = jnp.sum(attn_w[:, :, None] * enc, axis=1)                   # (TB, E2)
    ctx_sc[...] = ctx

    # ----- single GRU step (PyTorch gate order r, z, n), fused 3H matmuls ----
    gi = (jnp.dot(emb, wi_e_ref[...], preferred_element_type=f32)
          + jnp.dot(ctx, wi_c_ref[...], preferred_element_type=f32)
          + bi_ref[...])                                              # (TB, 3H)
    gh = jnp.dot(h, wh_ref[...], preferred_element_type=f32) + bh_ref[...]
    r = jax.nn.sigmoid(gi[:, :H] + gh[:, :H])
    z = jax.nn.sigmoid(gi[:, H:2 * H] + gh[:, H:2 * H])
    n = jnp.tanh(gi[:, 2 * H:] + r * gh[:, 2 * H:])
    h_new = (1.0 - z) * n + z * h                                     # (TB, H)
    hn_sc[...] = h_new
    hnew_ref[...] = h_new.astype(hnew_ref.dtype)

  # ----- fc_out for this vocab tile (concat-free K-split) -----
  logits = (jnp.dot(emb_ref[...], wf_e_ref[...], preferred_element_type=f32)
            + jnp.dot(ctx_sc[...], wf_c_ref[...], preferred_element_type=f32)
            + jnp.dot(hn_sc[...], wf_h_ref[...], preferred_element_type=f32)
            + bfc_ref[...])                                           # (TB, TN)
  out_ref[...] = logits.astype(out_ref.dtype)


def init_params(key, V, De, Eenc, H, pad_idx):
  E2 = 2 * Eenc
  Dx = De + E2
  Dfc = De + E2 + H
  ks = jax.random.split(key, 10)
  u = lambda k, shape: jax.random.uniform(k, shape, jnp.float32, -0.1, 0.1)
  return dict(
      emb_table=u(ks[0], (V, De)).at[pad_idx].set(0.0),
      wa=u(ks[1], (H, H + E2)),        # attention.W.weight  (out, in)
      ba=u(ks[2], (H,)),               # attention.W.bias
      v=u(ks[3], (1, H)),              # attention.v.weight
      w_ih=u(ks[4], (3 * H, Dx)),      # rnn.weight_ih_l0
      w_hh=u(ks[5], (3 * H, H)),       # rnn.weight_hh_l0
      b_ih=u(ks[6], (3 * H,)),
      b_hh=u(ks[7], (3 * H,)),
      w_fc=u(ks[8], (V, Dfc)),         # fc_out.weight
      b_fc=u(ks[9], (V,)),
  )


def decoder_forward(trg, hidden_state, encoder_outputs, mask, p):
  """trg: (B,) int32; hidden_state: (1,B,H); encoder_outputs: (B,S,E2); mask: (B,1,S)."""
  B, S, E2 = encoder_outputs.shape
  H = hidden_state.shape[-1]
  De = p['emb_table'].shape[1]
  V = p['w_fc'].shape[0]
  f32 = jnp.float32

  # Tile sizes: batch folded into sublanes, vocab tiled over lanes.
  TB = min(128, _round_up(B, 8))
  Bp = _round_up(B, TB)
  TN = min(512, _round_up(V, 128))
  Vp = _round_up(V, TN)
  nb = Bp // TB
  nv = Vp // TN

  # Glue outside the kernel: embedding gather + batch-major layout + padding.
  # TODO(synk): embedding row gather has no tidy BlockSpec form; kept in XLA.
  emb = p['emb_table'][trg]                      # (B, De)
  h = hidden_state[0]                            # (B, H)
  msk = mask.reshape(B, S).astype(f32)           # (B, S)

  def pad_b(x):
    return jnp.pad(x, ((0, Bp - B),) + ((0, 0),) * (x.ndim - 1))
  emb = pad_b(emb)
  h = pad_b(h)
  enc = pad_b(encoder_outputs)
  msk = pad_b(msk)

  # Attention weights, K-split: [dec_hidden | encoder_outputs].
  wa_h_t = p['wa'][:, :H].T                      # (H, H)
  wa_e_t = p['wa'][:, H:].T                      # (E2, H)
  ba = p['ba'][None, :]                          # (1, H)
  v = p['v']                                     # (1, H)

  # Fused GRU weights (all three gates), K-split: [emb | context].
  w_ih_t = p['w_ih'].T                           # (De+E2, 3H)
  wi_e_t = w_ih_t[:De]                           # (De, 3H)
  wi_c_t = w_ih_t[De:]                           # (E2, 3H)
  wh_t = p['w_hh'].T                             # (H, 3H)
  b_i = p['b_ih'][None, :]                       # (1, 3H)
  b_h = p['b_hh'][None, :]                       # (1, 3H)

  # fc_out, K-split: [emb | context | h_new]; vocab padded to Vp.
  w_fc_t = jnp.pad(p['w_fc'].T, ((0, 0), (0, Vp - V)))   # (Dfc, Vp)
  wf_e_t = w_fc_t[:De]
  wf_c_t = w_fc_t[De:De + E2]
  wf_h_t = w_fc_t[De + E2:]
  b_fc = jnp.pad(p['b_fc'], (0, Vp - V))[None, :]        # (1, Vp)

  whole = lambda a: pl.BlockSpec(a.shape, lambda i, j: (0,) * a.ndim)
  vtile = lambda a: pl.BlockSpec((a.shape[0], TN), lambda i, j: (0, j))

  out, h_new, attn = pl.pallas_call(
      decoder_step_kernel,
      out_shape=(
          jax.ShapeDtypeStruct((Bp, Vp), f32),
          jax.ShapeDtypeStruct((Bp, H), f32),
          jax.ShapeDtypeStruct((Bp, S), f32),
      ),
      grid=(nb, nv),
      in_specs=[
          pl.BlockSpec((TB, De), lambda i, j: (i, 0)),
          pl.BlockSpec((TB, H), lambda i, j: (i, 0)),
          pl.BlockSpec((TB, S, E2), lambda i, j: (i, 0, 0)),
          pl.BlockSpec((TB, S), lambda i, j: (i, 0)),
          whole(wa_h_t), whole(wa_e_t), whole(ba), whole(v),
          whole(wi_e_t), whole(wi_c_t), whole(wh_t), whole(b_i), whole(b_h),
          vtile(wf_e_t), vtile(wf_c_t), vtile(wf_h_t), vtile(b_fc),
      ],
      out_specs=[
          pl.BlockSpec((TB, TN), lambda i, j: (i, j)),
          pl.BlockSpec((TB, H), lambda i, j: (i, 0)),
          pl.BlockSpec((TB, S), lambda i, j: (i, 0)),
      ],
      scratch_shapes=[
          pltpu.VMEM((TB, E2), f32),   # context cache
          pltpu.VMEM((TB, H), f32),    # h_new cache
      ],
      compiler_params=pltpu.CompilerParams(
          dimension_semantics=("parallel", "arbitrary")),
  )(emb, h, enc, msk,
    wa_h_t, wa_e_t, ba, v,
    wi_e_t, wi_c_t, wh_t, b_i, b_h,
    wf_e_t, wf_c_t, wf_h_t, b_fc)

  return out[:B, :V], h_new[None, :B, :], attn[:B, :]


def decoder_reference(trg, hidden_state, encoder_outputs, mask, p):
  """Pure-JAX reference mirroring the PyTorch module."""
  B, S, E2 = encoder_outputs.shape
  H = hidden_state.shape[-1]
  emb = p['emb_table'][trg][:, None, :]                       # (B,1,De)
  h = jnp.transpose(hidden_state, (1, 0, 2))                  # (B,1,H)
  h_rep = jnp.broadcast_to(h, (B, S, H))
  cat = jnp.concatenate([h_rep, encoder_outputs], axis=2)
  energy = jnp.tanh(jnp.einsum('bsd,hd->bsh', cat, p['wa']) + p['ba'])
  score = jnp.einsum('bsh,oh->bos', energy, p['v'])           # (B,1,S)
  score = jnp.where(mask == 0.0, -1e10, score)
  score = score - jnp.max(score, axis=2, keepdims=True)
  e = jnp.exp(score)
  w = e / jnp.sum(e, axis=2, keepdims=True)
  context = jnp.einsum('bos,bse->boe', w, encoder_outputs)    # (B,1,E2)
  x = jnp.concatenate([emb, context], axis=2)[:, 0, :]
  h2 = h[:, 0, :]
  gi = x @ p['w_ih'].T + p['b_ih']
  gh = h2 @ p['w_hh'].T + p['b_hh']
  r = jax.nn.sigmoid(gi[:, :H] + gh[:, :H])
  z = jax.nn.sigmoid(gi[:, H:2 * H] + gh[:, H:2 * H])
  n = jnp.tanh(gi[:, 2 * H:] + r * gh[:, 2 * H:])
  h_new = (1.0 - z) * n + z * h2
  xo = jnp.concatenate([emb[:, 0, :], context[:, 0, :], h_new], axis=1)
  out = xo @ p['w_fc'].T + p['b_fc']
  return out, h_new[None], w[:, 0, :]


if __name__ == "__main__":
  B, S = 2, 8
  V, De, Eenc, H = 64, 32, 16, 32        # trg_vocab, emb_dim, enc_hidden, dec_hidden
  pad_idx = 0

  key = jax.random.PRNGKey(0)
  kp, k1, k2, k3 = jax.random.split(key, 4)
  params = init_params(kp, V, De, Eenc, H, pad_idx)

  trg = jax.random.randint(k1, (B,), 0, V)                              # (B,)
  hidden_state = jax.random.normal(k2, (1, B, H), jnp.float32)          # (1,B,H)
  encoder_outputs = jax.random.normal(k3, (B, S, 2 * Eenc), jnp.float32)  # (B,S,2*Eenc)
  lengths = jnp.array([S, 5])
  mask = (jnp.arange(S)[None, :] < lengths[:, None]).astype(jnp.float32)[:, None, :]  # (B,1,S)

  out, h_new, attn = decoder_forward(trg, hidden_state, encoder_outputs, mask, params)
  jax.block_until_ready((out, h_new, attn))

  r_out, r_h, r_attn = decoder_reference(trg, hidden_state, encoder_outputs, mask, params)
  assert out.shape == (B, V) and h_new.shape == (1, B, H) and attn.shape == (B, S)
  # pl.reciprocal(approx=True) in the softmax -> slightly looser tolerance than pure f32.
  assert jnp.allclose(out, r_out, atol=1e-3, rtol=1e-3)
  assert jnp.allclose(h_new, r_h, atol=1e-3, rtol=1e-3)
  assert jnp.allclose(attn, r_attn, atol=1e-3, rtol=1e-3)
  print("KERNEL_OK")
</pallas_src>

<mosaic_0001>
module attributes {stable_mosaic.version = 11 : i64} {
  func.func @decoder_step_kernel(%arg0: i32, %arg1: i32, %arg2: memref<8x32xf32, #tpu.memory_space<vmem>>, %arg3: memref<8x32xf32, #tpu.memory_space<vmem>>, %arg4: memref<8x8x32xf32, #tpu.memory_space<vmem>>, %arg5: memref<8x8xf32, #tpu.memory_space<vmem>>, %arg6: memref<32x32xf32, #tpu.memory_space<vmem>>, %arg7: memref<32x32xf32, #tpu.memory_space<vmem>>, %arg8: memref<1x32xf32, #tpu.memory_space<vmem>>, %arg9: memref<1x32xf32, #tpu.memory_space<vmem>>, %arg10: memref<32x96xf32, #tpu.memory_space<vmem>>, %arg11: memref<32x96xf32, #tpu.memory_space<vmem>>, %arg12: memref<32x96xf32, #tpu.memory_space<vmem>>, %arg13: memref<1x96xf32, #tpu.memory_space<vmem>>, %arg14: memref<1x96xf32, #tpu.memory_space<vmem>>, %arg15: memref<32x128xf32, #tpu.memory_space<vmem>>, %arg16: memref<32x128xf32, #tpu.memory_space<vmem>>, %arg17: memref<32x128xf32, #tpu.memory_space<vmem>>, %arg18: memref<1x128xf32, #tpu.memory_space<vmem>>, %arg19: memref<8x128xf32, #tpu.memory_space<vmem>>, %arg20: memref<8x32xf32, #tpu.memory_space<vmem>>, %arg21: memref<8x8xf32, #tpu.memory_space<vmem>>, %arg22: memref<8x32xf32, #tpu.memory_space<vmem>>, %arg23: memref<8x32xf32, #tpu.memory_space<vmem>>) attributes {dimension_semantics = [#tpu.dimension_semantics<parallel>, #tpu.dimension_semantics<arbitrary>], iteration_bounds = array<i64: 1, 1>, scalar_prefetch = 0 : i64, scratch_operands = 2 : i64, tpu.core_type = #tpu.core_type<tc>, window_params = [{transform_indices = @transform_0, window_bounds = array<i64: 8, 32>}, {transform_indices = @transform_1, window_bounds = array<i64: 8, 32>}, {transform_indices = @transform_2, window_bounds = array<i64: 8, 8, 32>}, {transform_indices = @transform_3, window_bounds = array<i64: 8, 8>}, {pipeline_mode = #tpu.pipeline_mode<synchronous>, transform_indices = @transform_4, window_bounds = array<i64: 32, 32>}, {pipeline_mode = #tpu.pipeline_mode<synchronous>, transform_indices = @transform_5, window_bounds = array<i64: 32, 32>}, {pipeline_mode = #tpu.pipeline_mode<synchronous>, transform_indices = @transform_6, window_bounds = array<i64: 1, 32>}, {pipeline_mode = #tpu.pipeline_mode<synchronous>, transform_indices = @transform_7, window_bounds = array<i64: 1, 32>}, {pipeline_mode = #tpu.pipeline_mode<synchronous>, transform_indices = @transform_8, window_bounds = array<i64: 32, 96>}, {pipeline_mode = #tpu.pipeline_mode<synchronous>, transform_indices = @transform_9, window_bounds = array<i64: 32, 96>}, {pipeline_mode = #tpu.pipeline_mode<synchronous>, transform_indices = @transform_10, window_bounds = array<i64: 32, 96>}, {pipeline_mode = #tpu.pipeline_mode<synchronous>, transform_indices = @transform_11, window_bounds = array<i64: 1, 96>}, {pipeline_mode = #tpu.pipeline_mode<synchronous>, transform_indices = @transform_12, window_bounds = array<i64: 1, 96>}, {transform_indices = @transform_13, window_bounds = array<i64: 32, 128>}, {transform_indices = @transform_14, window_bounds = array<i64: 32, 128>}, {transform_indices = @transform_15, window_bounds = array<i64: 32, 128>}, {transform_indices = @transform_16, window_bounds = array<i64: 1, 128>}, {transform_indices = @transform_17, window_bounds = array<i64: 8, 128>}, {transform_indices = @transform_18, window_bounds = array<i64: 8, 32>}, {transform_indices = @transform_19, window_bounds = array<i64: 8, 8>}]} {
    %c0_i32 = arith.constant 0 : i32
    %0 = arith.cmpi eq, %arg1, %c0_i32 : i32
    %1 = arith.extui %0 : i1 to i32
    %c0_i32_0 = arith.constant 0 : i32
    %2 = arith.cmpi ne, %1, %c0_i32_0 : i32
    scf.if %2 {
      %c0_18 = arith.constant 0 : index
      %c0_19 = arith.constant 0 : index
      %18 = vector.load %arg2[%c0_18, %c0_19] : memref<8x32xf32, #tpu.memory_space<vmem>>, vector<8x32xf32>
      %c0_20 = arith.constant 0 : index
      %c0_21 = arith.constant 0 : index
      %19 = vector.load %arg3[%c0_20, %c0_21] : memref<8x32xf32, #tpu.memory_space<vmem>>, vector<8x32xf32>
      %c0_22 = arith.constant 0 : index
      %c0_23 = arith.constant 0 : index
      %c0_24 = arith.constant 0 : index
      %20 = vector.load %arg4[%c0_22, %c0_23, %c0_24] : memref<8x8x32xf32, #tpu.memory_space<vmem>>, vector<8x8x32xf32>
      %c0_25 = arith.constant 0 : index
      %c0_26 = arith.constant 0 : index
      %21 = vector.load %arg5[%c0_25, %c0_26] : memref<8x8xf32, #tpu.memory_space<vmem>>, vector<8x8xf32>
      %c0_27 = arith.constant 0 : index
      %c0_28 = arith.constant 0 : index
      %22 = vector.load %arg6[%c0_27, %c0_28] : memref<32x32xf32, #tpu.memory_space<vmem>>, vector<32x32xf32>
      %cst_29 = arith.constant dense<0.000000e+00> : vector<8x32xf32>
      %23 = tpu.matmul %19, %22, %cst_29 {dimension_numbers = #tpu.dot_dimension_numbers<[1], [0], [0], [1], [0, 0, 1, 1], [], []>} : vector<8x32xf32>, vector<32x32xf32>, vector<8x32xf32> -> vector<8x32xf32>
      %24 = vector.shape_cast %20 : vector<8x8x32xf32> to vector<64x32xf32>
      %c0_30 = arith.constant 0 : index
      %c0_31 = arith.constant 0 : index
      %25 = vector.load %arg7[%c0_30, %c0_31] : memref<32x32xf32, #tpu.memory_space<vmem>>, vector<32x32xf32>
      %cst_32 = arith.constant dense<0.000000e+00> : vector<64x32xf32>
      %26 = tpu.matmul %24, %25, %cst_32 {dimension_numbers = #tpu.dot_dimension_numbers<[1], [0], [0], [1], [0, 0, 1, 1], [], []>} : vector<64x32xf32>, vector<32x32xf32>, vector<64x32xf32> -> vector<64x32xf32>
      %27 = vector.shape_cast %26 : vector<64x32xf32> to vector<8x8x32xf32>
      %28 = vector.shape_cast %23 : vector<8x32xf32> to vector<8x1x32xf32>
      %29 = vector.broadcast %28 : vector<8x1x32xf32> to vector<8x8x32xf32>
      %30 = arith.addf %29, %27 : vector<8x8x32xf32>
      %c0_33 = arith.constant 0 : index
      %c0_34 = arith.constant 0 : index
      %31 = vector.load %arg8[%c0_33, %c0_34] : memref<1x32xf32, #tpu.memory_space<vmem>>, vector<1x32xf32>
      %32 = vector.shape_cast %31 : vector<1x32xf32> to vector<1x1x32xf32>
      %33 = vector.broadcast %32 : vector<1x1x32xf32> to vector<8x8x32xf32>
      %34 = arith.addf %30, %33 : vector<8x8x32xf32>
      %35 = math.tanh %34 : vector<8x8x32xf32>
      %c0_35 = arith.constant 0 : index
      %c0_36 = arith.constant 0 : index
      %36 = vector.load %arg9[%c0_35, %c0_36] : memref<1x32xf32, #tpu.memory_space<vmem>>, vector<1x32xf32>
      %37 = vector.shape_cast %36 : vector<1x32xf32> to vector<1x1x32xf32>
      %38 = vector.broadcast %37 : vector<1x1x32xf32> to vector<8x8x32xf32>
      %39 = arith.mulf %35, %38 : vector<8x8x32xf32>
      %cst_37 = arith.constant dense<0.000000e+00> : vector<8x8xf32>
      %40 = vector.multi_reduction <add>, %39, %cst_37 [2] : vector<8x8x32xf32> to vector<8x8xf32>
      %cst_38 = arith.constant 0.000000e+00 : f32
      %41 = vector.broadcast %cst_38 : f32 to vector<8x8xf32>
      %42 = arith.cmpf oeq, %21, %41 : vector<8x8xf32>
      %cst_39 = arith.constant -1.000000e+10 : f32
      %43 = vector.broadcast %cst_39 : f32 to vector<8x8xf32>
      %44 = arith.select %42, %43, %40 : vector<8x8xi1>, vector<8x8xf32>
      %cst_40 = arith.constant dense<0xFF800000> : vector<8xf32>
      %45 = vector.multi_reduction <maximumf>, %44, %cst_40 [1] : vector<8x8xf32> to vector<8xf32>
      %46 = vector.shape_cast %45 : vector<8xf32> to vector<8x1xf32>
      %47 = vector.broadcast %46 : vector<8x1xf32> to vector<8x8xf32>
      %48 = arith.subf %44, %47 : vector<8x8xf32>
      %49 = math.exp %48 : vector<8x8xf32>
      %cst_41 = arith.constant dense<0.000000e+00> : vector<8xf32>
      %50 = vector.multi_reduction <add>, %49, %cst_41 [1] : vector<8x8xf32> to vector<8xf32>
      %51 = vector.shape_cast %50 : vector<8xf32> to vector<8x1xf32>
      %52 = tpu.reciprocal %51 {approx = true} : vector<8x1xf32> -> vector<8x1xf32>
      %53 = vector.broadcast %52 : vector<8x1xf32> to vector<8x8xf32>
      %54 = arith.mulf %49, %53 : vector<8x8xf32>
      %c0_42 = arith.constant 0 : index
      %c0_43 = arith.constant 0 : index
      %55 = vector.load %arg21[%c0_42, %c0_43] : memref<8x8xf32, #tpu.memory_space<vmem>>, vector<8x8xf32>
      tpu.vector_store %arg21[%c0_42, %c0_43], %54 {strides = array<i32>} : memref<8x8xf32, #tpu.memory_space<vmem>>, vector<8x8xf32>,
      %56 = vector.shape_cast %54 : vector<8x8xf32> to vector<8x8x1xf32>
      %57 = vector.broadcast %56 : vector<8x8x1xf32> to vector<8x8x32xf32>
      %58 = arith.mulf %57, %20 : vector<8x8x32xf32>
      %cst_44 = arith.constant dense<0.000000e+00> : vector<8x32xf32>
      %59 = vector.multi_reduction <add>, %58, %cst_44 [1] : vector<8x8x32xf32> to vector<8x32xf32>
      %c0_45 = arith.constant 0 : index
      %c0_46 = arith.constant 0 : index
      %60 = vector.load %arg22[%c0_45, %c0_46] : memref<8x32xf32, #tpu.memory_space<vmem>>, vector<8x32xf32>
      tpu.vector_store %arg22[%c0_45, %c0_46], %59 {strides = array<i32>} : memref<8x32xf32, #tpu.memory_space<vmem>>, vector<8x32xf32>,
      %c0_47 = arith.constant 0 : index
      %c0_48 = arith.constant 0 : index
      %61 = vector.load %arg10[%c0_47, %c0_48] : memref<32x96xf32, #tpu.memory_space<vmem>>, vector<32x96xf32>
      %cst_49 = arith.constant dense<0.000000e+00> : vector<8x96xf32>
      %62 = tpu.matmul %18, %61, %cst_49 {dimension_numbers = #tpu.dot_dimension_numbers<[1], [0], [0], [1], [0, 0, 1, 1], [], []>} : vector<8x32xf32>, vector<32x96xf32>, vector<8x96xf32> -> vector<8x96xf32>
      %c0_50 = arith.constant 0 : index
      %c0_51 = arith.constant 0 : index
      %63 = vector.load %arg11[%c0_50, %c0_51] : memref<32x96xf32, #tpu.memory_space<vmem>>, vector<32x96xf32>
      %cst_52 = arith.constant dense<0.000000e+00> : vector<8x96xf32>
      %64 = tpu.matmul %59, %63, %cst_52 {dimension_numbers = #tpu.dot_dimension_numbers<[1], [0], [0], [1], [0, 0, 1, 1], [], []>} : vector<8x32xf32>, vector<32x96xf32>, vector<8x96xf32> -> vector<8x96xf32>
      %65 = arith.addf %62, %64 : vector<8x96xf32>
      %c0_53 = arith.constant 0 : index
      %c0_54 = arith.constant 0 : index
      %66 = vector.load %arg13[%c0_53, %c0_54] : memref<1x96xf32, #tpu.memory_space<vmem>>, vector<1x96xf32>
      %67 = vector.broadcast %66 : vector<1x96xf32> to vector<8x96xf32>
      %68 = arith.addf %65, %67 : vector<8x96xf32>
      %c0_55 = arith.constant 0 : index
      %c0_56 = arith.constant 0 : index
      %69 = vector.load %arg12[%c0_55, %c0_56] : memref<32x96xf32, #tpu.memory_space<vmem>>, vector<32x96xf32>
      %cst_57 = arith.constant dense<0.000000e+00> : vector<8x96xf32>
      %70 = tpu.matmul %19, %69, %cst_57 {dimension_numbers = #tpu.dot_dimension_numbers<[1], [0], [0], [1], [0, 0, 1, 1], [], []>} : vector<8x32xf32>, vector<32x96xf32>, vector<8x96xf32> -> vector<8x96xf32>
      %c0_58 = arith.constant 0 : index
      %c0_59 = arith.constant 0 : index
      %71 = vector.load %arg14[%c0_58, %c0_59] : memref<1x96xf32, #tpu.memory_space<vmem>>, vector<1x96xf32>
      %72 = vector.broadcast %71 : vector<1x96xf32> to vector<8x96xf32>
      %73 = arith.addf %70, %72 : vector<8x96xf32>
      %74 = vector.extract_strided_slice %68 {offsets = [0, 0], sizes = [8, 32], strides = [1, 1]} : vector<8x96xf32> to vector<8x32xf32>
      %75 = vector.extract_strided_slice %73 {offsets = [0, 0], sizes = [8, 32], strides = [1, 1]} : vector<8x96xf32> to vector<8x32xf32>
      %76 = arith.addf %74, %75 : vector<8x32xf32>
      %77 = arith.negf %76 : vector<8x32xf32>
      %78 = math.exp %77 : vector<8x32xf32>
      %cst_60 = arith.constant 1.000000e+00 : f32
      %79 = vector.broadcast %cst_60 : f32 to vector<8x32xf32>
      %80 = arith.addf %79, %78 : vector<8x32xf32>
      %81 = arith.divf %79, %80 : vector<8x32xf32>
      %82 = vector.extract_strided_slice %68 {offsets = [0, 32], sizes = [8, 32], strides = [1, 1]} : vector<8x96xf32> to vector<8x32xf32>
      %83 = vector.extract_strided_slice %73 {offsets = [0, 32], sizes = [8, 32], strides = [1, 1]} : vector<8x96xf32> to vector<8x32xf32>
      %84 = arith.addf %82, %83 : vector<8x32xf32>
      %85 = arith.negf %84 : vector<8x32xf32>
      %86 = math.exp %85 : vector<8x32xf32>
      %cst_61 = arith.constant 1.000000e+00 : f32
      %87 = vector.broadcast %cst_61 : f32 to vector<8x32xf32>
      %88 = arith.addf %87, %86 : vector<8x32xf32>
      %89 = arith.divf %87, %88 : vector<8x32xf32>
      %90 = vector.extract_strided_slice %68 {offsets = [0, 64], sizes = [8, 32], strides = [1, 1]} : vector<8x96xf32> to vector<8x32xf32>
      %91 = vector.extract_strided_slice %73 {offsets = [0, 64], sizes = [8, 32], strides = [1, 1]} : vector<8x96xf32> to vector<8x32xf32>
      %92 = arith.mulf %81, %91 : vector<8x32xf32>
      %93 = arith.addf %90, %92 : vector<8x32xf32>
      %94 = math.tanh %93 : vector<8x32xf32>
      %cst_62 = arith.constant 1.000000e+00 : f32
      %95 = vector.broadcast %cst_62 : f32 to vector<8x32xf32>
      %96 = arith.subf %95, %89 : vector<8x32xf32>
      %97 = arith.mulf %96, %94 : vector<8x32xf32>
      %98 = arith.mulf %89, %19 : vector<8x32xf32>
      %99 = arith.addf %97, %98 : vector<8x32xf32>
      %c0_63 = arith.constant 0 : index
      %c0_64 = arith.constant 0 : index
      %100 = vector.load %arg23[%c0_63, %c0_64] : memref<8x32xf32, #tpu.memory_space<vmem>>, vector<8x32xf32>
      tpu.vector_store %arg23[%c0_63, %c0_64], %99 {strides = array<i32>} : memref<8x32xf32, #tpu.memory_space<vmem>>, vector<8x32xf32>,
      %c0_65 = arith.constant 0 : index
      %c0_66 = arith.constant 0 : index
      %101 = vector.load %arg20[%c0_65, %c0_66] : memref<8x32xf32, #tpu.memory_space<vmem>>, vector<8x32xf32>
      tpu.vector_store %arg20[%c0_65, %c0_66], %99 {strides = array<i32>} : memref<8x32xf32, #tpu.memory_space<vmem>>, vector<8x32xf32>,
    } else {
    }
    %c0 = arith.constant 0 : index
    %c0_1 = arith.constant 0 : index
    %3 = vector.load %arg2[%c0, %c0_1] : memref<8x32xf32, #tpu.memory_space<vmem>>, vector<8x32xf32>
    %c0_2 = arith.constant 0 : index
    %c0_3 = arith.constant 0 : index
    %4 = vector.load %arg15[%c0_2, %c0_3] : memref<32x128xf32, #tpu.memory_space<vmem>>, vector<32x128xf32>
    %cst = arith.constant dense<0.000000e+00> : vector<8x128xf32>
    %5 = tpu.matmul %3, %4, %cst {dimension_numbers = #tpu.dot_dimension_numbers<[1], [0], [0], [1], [0, 0, 1, 1], [], []>} : vector<8x32xf32>, vector<32x128xf32>, vector<8x128xf32> -> vector<8x128xf32>
    %c0_4 = arith.constant 0 : index
    %c0_5 = arith.constant 0 : index
    %6 = vector.load %arg22[%c0_4, %c0_5] : memref<8x32xf32, #tpu.memory_space<vmem>>, vector<8x32xf32>
    %c0_6 = arith.constant 0 : index
    %c0_7 = arith.constant 0 : index
    %7 = vector.load %arg16[%c0_6, %c0_7] : memref<32x128xf32, #tpu.memory_space<vmem>>, vector<32x128xf32>
    %cst_8 = arith.constant dense<0.000000e+00> : vector<8x128xf32>
    %8 = tpu.matmul %6, %7, %cst_8 {dimension_numbers = #tpu.dot_dimension_numbers<[1], [0], [0], [1], [0, 0, 1, 1], [], []>} : vector<8x32xf32>, vector<32x128xf32>, vector<8x128xf32> -> vector<8x128xf32>
    %9 = arith.addf %5, %8 : vector<8x128xf32>
    %c0_9 = arith.constant 0 : index
    %c0_10 = arith.constant 0 : index
    %10 = vector.load %arg23[%c0_9, %c0_10] : memref<8x32xf32, #tpu.memory_space<vmem>>, vector<8x32xf32>
    %c0_11 = arith.constant 0 : index
    %c0_12 = arith.constant 0 : index
    %11 = vector.load %arg17[%c0_11, %c0_12] : memref<32x128xf32, #tpu.memory_space<vmem>>, vector<32x128xf32>
    %cst_13 = arith.constant dense<0.000000e+00> : vector<8x128xf32>
    %12 = tpu.matmul %10, %11, %cst_13 {dimension_numbers = #tpu.dot_dimension_numbers<[1], [0], [0], [1], [0, 0, 1, 1], [], []>} : vector<8x32xf32>, vector<32x128xf32>, vector<8x128xf32> -> vector<8x128xf32>
    %13 = arith.addf %9, %12 : vector<8x128xf32>
    %c0_14 = arith.constant 0 : index
    %c0_15 = arith.constant 0 : index
    %14 = vector.load %arg18[%c0_14, %c0_15] : memref<1x128xf32, #tpu.memory_space<vmem>>, vector<1x128xf32>
    %15 = vector.broadcast %14 : vector<1x128xf32> to vector<8x128xf32>
    %16 = arith.addf %13, %15 : vector<8x128xf32>
    %c0_16 = arith.constant 0 : index
    %c0_17 = arith.constant 0 : index
    %17 = vector.load %arg19[%c0_16, %c0_17] : memref<8x128xf32, #tpu.memory_space<vmem>>, vector<8x128xf32>
    tpu.vector_store %arg19[%c0_16, %c0_17], %16 {strides = array<i32>} : memref<8x128xf32, #tpu.memory_space<vmem>>, vector<8x128xf32>,
    return
  }
  func.func @transform_0(%arg0: i32, %arg1: i32) -> (i32, i32) {
    %c0_i32 = arith.constant 0 : i32
    %c0_i32_0 = arith.constant 0 : i32
    return %arg0, %c0_i32 : i32, i32
  }
  func.func @transform_1(%arg0: i32, %arg1: i32) -> (i32, i32) {
    %c0_i32 = arith.constant 0 : i32
    %c0_i32_0 = arith.constant 0 : i32
    return %arg0, %c0_i32 : i32, i32
  }
  func.func @transform_2(%arg0: i32, %arg1: i32) -> (i32, i32, i32) {
    %c0_i32 = arith.constant 0 : i32
    %c0_i32_0 = arith.constant 0 : i32
    %c0_i32_1 = arith.constant 0 : i32
    return %arg0, %c0_i32, %c0_i32_0 : i32, i32, i32
  }
  func.func @transform_3(%arg0: i32, %arg1: i32) -> (i32, i32) {
    %c0_i32 = arith.constant 0 : i32
    %c0_i32_0 = arith.constant 0 : i32
    return %arg0, %c0_i32 : i32, i32
  }
  func.func @transform_4(%arg0: i32, %arg1: i32) -> (i32, i32) {
    %c0_i32 = arith.constant 0 : i32
    %c0_i32_0 = arith.constant 0 : i32
    %c0_i32_1 = arith.constant 0 : i32
    return %c0_i32, %c0_i32_0 : i32, i32
  }
  func.func @transform_5(%arg0: i32, %arg1: i32) -> (i32, i32) {
    %c0_i32 = arith.constant 0 : i32
    %c0_i32_0 = arith.constant 0 : i32
    %c0_i32_1 = arith.constant 0 : i32
    return %c0_i32, %c0_i32_0 : i32, i32
  }
  func.func @transform_6(%arg0: i32, %arg1: i32) -> (i32, i32) {
    %c0_i32 = arith.constant 0 : i32
    %c0_i32_0 = arith.constant 0 : i32
    %c0_i32_1 = arith.constant 0 : i32
    return %c0_i32, %c0_i32_0 : i32, i32
  }
  func.func @transform_7(%arg0: i32, %arg1: i32) -> (i32, i32) {
    %c0_i32 = arith.constant 0 : i32
    %c0_i32_0 = arith.constant 0 : i32
    %c0_i32_1 = arith.constant 0 : i32
    return %c0_i32, %c0_i32_0 : i32, i32
  }
  func.func @transform_8(%arg0: i32, %arg1: i32) -> (i32, i32) {
    %c0_i32 = arith.constant 0 : i32
    %c0_i32_0 = arith.constant 0 : i32
    %c0_i32_1 = arith.constant 0 : i32
    return %c0_i32, %c0_i32_0 : i32, i32
  }
  func.func @transform_9(%arg0: i32, %arg1: i32) -> (i32, i32) {
    %c0_i32 = arith.constant 0 : i32
    %c0_i32_0 = arith.constant 0 : i32
    %c0_i32_1 = arith.constant 0 : i32
    return %c0_i32, %c0_i32_0 : i32, i32
  }
  func.func @transform_10(%arg0: i32, %arg1: i32) -> (i32, i32) {
    %c0_i32 = arith.constant 0 : i32
    %c0_i32_0 = arith.constant 0 : i32
    %c0_i32_1 = arith.constant 0 : i32
    return %c0_i32, %c0_i32_0 : i32, i32
  }
  func.func @transform_11(%arg0: i32, %arg1: i32) -> (i32, i32) {
    %c0_i32 = arith.constant 0 : i32
    %c0_i32_0 = arith.constant 0 : i32
    %c0_i32_1 = arith.constant 0 : i32
    return %c0_i32, %c0_i32_0 : i32, i32
  }
  func.func @transform_12(%arg0: i32, %arg1: i32) -> (i32, i32) {
    %c0_i32 = arith.constant 0 : i32
    %c0_i32_0 = arith.constant 0 : i32
    %c0_i32_1 = arith.constant 0 : i32
    return %c0_i32, %c0_i32_0 : i32, i32
  }
  func.func @transform_13(%arg0: i32, %arg1: i32) -> (i32, i32) {
    %c0_i32 = arith.constant 0 : i32
    %c0_i32_0 = arith.constant 0 : i32
    return %c0_i32, %arg1 : i32, i32
  }
  func.func @transform_14(%arg0: i32, %arg1: i32) -> (i32, i32) {
    %c0_i32 = arith.constant 0 : i32
    %c0_i32_0 = arith.constant 0 : i32
    return %c0_i32, %arg1 : i32, i32
  }
  func.func @transform_15(%arg0: i32, %arg1: i32) -> (i32, i32) {
    %c0_i32 = arith.constant 0 : i32
    %c0_i32_0 = arith.constant 0 : i32
    return %c0_i32, %arg1 : i32, i32
  }
  func.func @transform_16(%arg0: i32, %arg1: i32) -> (i32, i32) {
    %c0_i32 = arith.constant 0 : i32
    %c0_i32_0 = arith.constant 0 : i32
    return %c0_i32, %arg1 : i32, i32
  }
  func.func @transform_17(%arg0: i32, %arg1: i32) -> (i32, i32) {
    %c0_i32 = arith.constant 0 : i32
    return %arg0, %arg1 : i32, i32
  }
  func.func @transform_18(%arg0: i32, %arg1: i32) -> (i32, i32) {
    %c0_i32 = arith.constant 0 : i32
    %c0_i32_0 = arith.constant 0 : i32
    return %arg0, %c0_i32 : i32, i32
  }
  func.func @transform_19(%arg0: i32, %arg1: i32) -> (i32, i32) {
    %c0_i32 = arith.constant 0 : i32
    %c0_i32_0 = arith.constant 0 : i32
    return %arg0, %c0_i32 : i32, i32
  }
}

</mosaic_0001>

<bundles_post_ra>
// kernel: tpu_custom_call.1
= control target key start
LH: loop header
LB: loop body
LE: loop exit
PB: predicated region body
PF: predicated region fallthrough
CT: control target
= control target key end

     0   :  { %s1660_s0 = inlined_call_operand.hbm [shape: f32[8,32], index: 0, kind: input, shape index: {}]   ;;  %s1661_s1 = inlined_call_operand.hbm [shape: f32[8,32], index: 1, kind: input, shape index: {}]   ;;  %s1662_s2 = inlined_call_operand.hbm [shape: f32[8,8,32], index: 2, kind: input, shape index: {}]   ;;  %s1663_s3 = inlined_call_operand.hbm [shape: f32[8,8], index: 3, kind: input, shape index: {}]   ;;  %s1664_s4 = inlined_call_operand.hbm [shape: f32[32,32], index: 4, kind: input, shape index: {}]   ;;  %s1665_s5 = inlined_call_operand.hbm [shape: f32[32,32], index: 5, kind: input, shape index: {}]   ;;  %s1666_s6 = inlined_call_operand.vmem [shape: f32[1,32], index: 6, kind: input, shape index: {}]   ;;  %s1667_s7 = inlined_call_operand.vmem [shape: f32[1,32], index: 7, kind: input, shape index: {}]   ;;  %s1668_s8 = inlined_call_operand.hbm [shape: f32[32,96], index: 8, kind: input, shape index: {}]   ;;  %s1669_s9 = inlined_call_operand.hbm [shape: f32[32,96], index: 9, kind: input, shape index: {}]   ;;  %s1670_s10 = inlined_call_operand.hbm [shape: f32[32,96], index: 10, kind: input, shape index: {}]   ;;  %s1671_s11 = inlined_call_operand.vmem [shape: f32[1,96], index: 11, kind: input, shape index: {}]   ;;  %s1672_s12 = inlined_call_operand.vmem [shape: f32[1,96], index: 12, kind: input, shape index: {}]   ;;  %s1673_s13 = inlined_call_operand.hbm [shape: f32[32,128], index: 13, kind: input, shape index: {}]   ;;  %s1674_s14 = inlined_call_operand.hbm [shape: f32[32,128], index: 14, kind: input, shape index: {}]   ;;  %s1675_s15 = inlined_call_operand.hbm [shape: f32[32,128], index: 15, kind: input, shape index: {}]   ;;  %s1676_s16 = inlined_call_operand.vmem [shape: f32[1,128], index: 16, kind: input, shape index: {}]   ;;  %s1677_s17 = inlined_call_operand.hbm [shape: f32[8,128], index: 17, kind: output, shape index: {0}]   ;;  %s1678_s18 = inlined_call_operand.hbm [shape: f32[8,32], index: 18, kind: output, shape index: {1}]   ;;  %s1679_s19 = inlined_call_operand.hbm [shape: f32[8,8], index: 19, kind: output, shape index: {2}]  }
   0x1   :  { %1680 = sst [smem:[#allocation37_spill]] %s1660_s0 }
   0x2   :  { %1681 = sst [smem:[#allocation38_spill]] %s1661_s1 }
   0x3   :  { %1682 = sst [smem:[#allocation39_spill]] %s1662_s2 }
   0x4   :  { %1683 = sst [smem:[#allocation40_spill]] %s1663_s3 }
   0x5   :  { %1684 = sst [smem:[#allocation41_spill]] %s1677_s17 }
   0x6   :  { %25 = vsyncpa [#allocation5], 0 }
   0x7   :  { %26 = vsyncpa [#allocation8], 0 }
   0x8   :  { %27 = vsyncpa [#allocation11], 0 }
   0x9   :  { %28 = vsyncpa [#allocation14], 0 }
   0xa   :  { %29 = vsyncpa [#allocation17], 0 }
   0xb   :  { %30 = vsyncpa [#allocation20], 0 }
   0xc   :  { %31 = vsyncpa [#allocation23], 0 }
   0xd   :  { %32 = vsyncpa [#allocation6], 0  ;;  %s1685_s20 = sld [smem:[#allocation38_spill]] }
  0x13   :  { %s50_s21 = sshll.u32 %s1685_s20, 4  ;;  %s51_s21 = int_to_ptr.hbm [resolvable:$true] %s50_s21 }
  0x14   :  { %33 = vsyncpa [#allocation26], 0  ;;  %s1363_s1 = smov [#allocation7]   ;;  %s1686_s24 = sld [smem:[#allocation40_spill]] }
  0x15   :  { %s52_s22 = sshll.u32 %s1363_s1, 4  ;;  %s1364_s3 = smov [#allocation10]   ;;  %s53_s22 = int_to_ptr.vmem [resolvable:$true] %s52_s22 }
  0x16   :  { %55 = dma.hbm_to_vmem [thread:$0]  %s51_s21, 128, %s53_s22, [#allocation8]  }
  0x17   :  { %s76_s26 = sshll.u32 %s1364_s3, 4  ;;  %s97_s29 = sshll.u32 %s1665_s5, 4  ;;  %s77_s26 = int_to_ptr.vmem [resolvable:$true] %s76_s26  ;;  %s98_s29 = int_to_ptr.hbm [resolvable:$true] %s97_s29 }
  0x18   :  { %s1365_s0 = smov [#allocation13]   ;;  %s127_s17 = sshll.u32 %s1669_s9, 4  ;;  %s128_s17 = int_to_ptr.hbm [resolvable:$true] %s127_s17 }
  0x19   :  { %s99_s30 = sshll.u32 %s1365_s0, 4  ;;  %s1366_s2 = smov 128   ;;  %s100_s30 = int_to_ptr.vmem [resolvable:$true] %s99_s30 }
  0x1a   :  { %s74_s25 = sshll.u32 %s1686_s24, 4  ;;  %s1367_s23 = smov 8   ;;  %s75_s25 = int_to_ptr.hbm [resolvable:$true] %s74_s25 }
  0x1b   :  { %79 = dma.hbm_to_vmem [thread:$0]  %s75_s25, 128, %s77_s26, [#allocation11]  }
  0x1c   :  { %105 = dma.hbm_to_vmem [thread:$0]  %s98_s29, 512, %s100_s30, [#allocation14], %s1366_s2, %s1366_s2, %s1367_s23  }
  0x1d   :  { %s1368_s21 = smov [#allocation16]   ;;  %s157_s5 = sshll.u32 %s1673_s13, 4  ;;  %s158_s5 = int_to_ptr.hbm [resolvable:$true] %s157_s5 }
  0x1e   :  { %s129_s22 = sshll.u32 %s1368_s21, 4  ;;  %s1687_s26 = sld [smem:[#allocation37_spill]]  ;;  %s130_s22 = int_to_ptr.vmem [resolvable:$true] %s129_s22 }
  0x1f   :  { %135 = dma.hbm_to_vmem [thread:$0]  %s128_s17, 512, %s130_s22, [#allocation17], %s1366_s2, %s1366_s2, %s1367_s23  }
  0x20   :  { %s1369_s28 = smov [#allocation19]   ;;  %s1370_s29 = smov [#allocation4]  }
  0x21   :  { %s159_s0 = sshll.u32 %s1369_s28, 4  ;;  %s41_s13 = sshll.u32 %s1370_s29, 4  ;;  %s160_s0 = int_to_ptr.vmem [resolvable:$true] %s159_s0  ;;  %s42_s13 = int_to_ptr.vmem [resolvable:$true] %s41_s13 }
  0x22   :  { %165 = dma.hbm_to_vmem [thread:$0]  %s158_s5, 512, %s160_s0, [#allocation20], %s1366_s2, %s1366_s2, %s1367_s23  }
  0x23   :  { %s1688_s1 = sld [smem:[#allocation39_spill]]  ;;  %s84_s24 = sshll.u32 %s1664_s4, 4  ;;  %s85_s24 = int_to_ptr.hbm [resolvable:$true] %s84_s24 }
  0x24   :  { %s39_s27 = sshll.u32 %s1687_s26, 4  ;;  %s1371_s25 = smov [#allocation9]   ;;  %s40_s27 = int_to_ptr.hbm [resolvable:$true] %s39_s27 }
  0x25   :  { %44 = dma.hbm_to_vmem [thread:$0]  %s40_s27, 128, %s42_s13, [#allocation5]  }
  0x26   :  { %s62_s9 = sshll.u32 %s1371_s25, 4  ;;  %s1372_s5 = smov [#allocation12]   ;;  %s63_s9 = int_to_ptr.vmem [resolvable:$true] %s62_s9 }
  0x27   :  { %s86_s3 = sshll.u32 %s1372_s5, 4  ;;  %s114_s0 = sshll.u32 %s1668_s8, 4  ;;  %s87_s3 = int_to_ptr.vmem [resolvable:$true] %s86_s3  ;;  %s115_s0 = int_to_ptr.hbm [resolvable:$true] %s114_s0 }
  0x28   :  { %92 = dma.hbm_to_vmem [thread:$0]  %s85_s24, 512, %s87_s3, [#allocation11], %s1366_s2, %s1366_s2, %s1367_s23  }
  0x29   :  { %s60_s21 = sshll.u32 %s1688_s1, 4  ;;  %s140_s29 = sshll.u32 %s1670_s10, 4  ;;  %s61_s21 = int_to_ptr.hbm [resolvable:$true] %s60_s21  ;;  %s141_s29 = int_to_ptr.hbm [resolvable:$true] %s140_s29 }
  0x2a   :  { %68 = dma.hbm_to_vmem [thread:$0]  %s61_s21, 1024, %s63_s9, [#allocation8], %s1366_s2, %s1366_s2, %s1367_s23  }
  0x2b   :  { %s1373_s13 = smov [#allocation15]   ;;  %s1374_s20 = smov [#allocation18]  }
  0x2c   :  { %s116_s30 = sshll.u32 %s1373_s13, 4  ;;  %s142_s8 = sshll.u32 %s1374_s20, 4  ;;  %s117_s30 = int_to_ptr.vmem [resolvable:$true] %s116_s30  ;;  %s143_s8 = int_to_ptr.vmem [resolvable:$true] %s142_s8 }
  0x2d   :  { %122 = dma.hbm_to_vmem [thread:$0]  %s115_s0, 512, %s117_s30, [#allocation14], %s1366_s2, %s1366_s2, %s1367_s23  }
  0x2e   :  { %s170_s17 = sshll.u32 %s1674_s14, 4  ;;  %s183_s24 = sshll.u32 %s1675_s15, 4  ;;  %s171_s17 = int_to_ptr.hbm [resolvable:$true] %s170_s17  ;;  %s184_s24 = int_to_ptr.hbm [resolvable:$true] %s183_s24 }
  0x2f   :  { %148 = dma.hbm_to_vmem [thread:$0]  %s141_s29, 512, %s143_s8, [#allocation17], %s1366_s2, %s1366_s2, %s1367_s23  }
  0x30   :  { %s1375_s25 = smov [#allocation21]   ;;  %s1376_s5 = smov [#allocation22]  }
  0x31   :  { %s172_s9 = sshll.u32 %s1375_s25, 4  ;;  %s185_s14 = sshll.u32 %s1376_s5, 4  ;;  %s173_s9 = int_to_ptr.vmem [resolvable:$true] %s172_s9  ;;  %s186_s14 = int_to_ptr.vmem [resolvable:$true] %s185_s14 }
  0x32   :  { %178 = dma.hbm_to_vmem [thread:$0]  %s171_s17, 512, %s173_s9, [#allocation20], %s1366_s2, %s1366_s2, %s1367_s23  }
  0x33   :  { %191 = dma.hbm_to_vmem [thread:$0]  %s184_s24, 512, %s186_s14, [#allocation23], %s1366_s2, %s1366_s2, %s1367_s23  }
  0x34   :  { %1345 = dma.done.wait [#allocation5], 128  }
  0x35   :  { %1346 = vsyncadd [#allocation5], 4294967168 }
  0x36   :  { %1347 = dma.done.wait [#allocation8], 1152  }
  0x37   :  { %1348 = vsyncadd [#allocation8], 4294966144 }
  0x38   :  { %1349 = dma.done.wait [#allocation11], 640  }
  0x39   :  { %1350 = vsyncadd [#allocation11], 4294966656 }
  0x3a   :  { %1351 = dma.done.wait [#allocation14], 1024  }
  0x3b   :  { %1352 = vsyncadd [#allocation14], 4294966272 }
  0x3c   :  { %1353 = dma.done.wait [#allocation17], 1024  }
  0x3d   :  { %1354 = vsyncadd [#allocation17], 4294966272 }
  0x3e   :  { %1355 = dma.done.wait [#allocation20], 1024  }
  0x3f   :  { %1356 = vsyncadd [#allocation20], 4294966272 }
  0x40   :  { %1357 = dma.done.wait [#allocation23], 512  }
  0x41   :  { %1358 = vsyncadd [#allocation23], 4294966784  ;;  %v260_v0 = vld [vmem:[#allocation12 + $0x18] sm:$0xff]  ;;  %v259_v2 = vld [vmem:[#allocation12 + $0x10] sm:$0xff]  ;;  %vm261_vm0 = vcmask 261120   ;;  %vm461_vm1 = vcmask 1041409  }
  0x42   :  { %v288_v1 = vld [vmem:[#allocation13 + $0x18] sm:$0xff]  ;;  %277 = vmatpush.msra.mxu0 %v260_v0  ;;  %v287_v3 = vld [vmem:[#allocation13 + $0x10] sm:$0xff]  ;;  %v258_v4 = vld [vmem:[#allocation12 + $0x8] sm:$0xff]  ;;  %vm463_vm2 = vcmask 1042434   ;;  %vm465_vm3 = vcmask 1043459   ;;  %vm467_vm4 = vcmask 1044484  }
  0x43   :  { %325 = vmatpush.msra.mxu1 %v288_v1  ;;  %923 = vmatpush.msra.mxu2 %v288_v1  ;;  %v286_v5 = vld [vmem:[#allocation13 + $0x8] sm:$0xff]  ;;  %v257_v6 = vld [vmem:[#allocation12] sm:$0xff]  ;;  %v1546_v8 = vld [vmem:[#allocation7] sm:$0xff]  ;;  %vm469_vm5 = vcmask 1045509   ;;  %vm471_vm6 = vcmask 1046534   ;;  %vm473_vm7 = vcmask 1047559  }
  0x44   :  { %924 = vmatpush.msra.mxu3 %v288_v1  ;;  %278 = vmatpush.msra.mxu0 %v259_v2  ;;  %v285_v7 = vld [vmem:[#allocation13] sm:$0xff]  ;;  %v1548_v9 = vld [vmem:[#allocation9] sm:$0xff]  ;;  %v1552_v11 = vld [vmem:[#allocation9 + $0x30] sm:$0xff]  ;;  %vm477_vm9 = vcmask 64512   ;;  %s1377_s26 = smov 64   ;;  %s1380_s4 = smov [#allocation25]  }
  0x45   :  { %326 = vmatpush.msra.mxu1 %v287_v3  ;;  %925 = vmatpush.msra.mxu2 %v287_v3  ;;  %v1550_v10 = vld [vmem:[#allocation9 + $0x20] sm:$0xff]  ;;  %v1562_v12 = vld [vmem:[#allocation9 + $0x8] sm:$0xff]  ;;  %v1566_v14 = vld [vmem:[#allocation9 + $0x38] sm:$0xff]  ;;  %s869_s27 = sshll.u32 %s1380_s4, 4  ;;  %s871_s30 = sshll.u32 %s1678_s18, 4  ;;  %s870_s27 = int_to_ptr.vmem [resolvable:$true] %s869_s27  ;;  %s872_s30 = int_to_ptr.hbm [resolvable:$true] %s871_s30 }
  0x46   :  { %926 = vmatpush.msra.mxu3 %v287_v3  ;;  %279 = vmatpush.msra.mxu0 %v258_v4  ;;  %v1564_v13 = vld [vmem:[#allocation9 + $0x28] sm:$0xff]  ;;  %v1574_v15 = vld [vmem:[#allocation9 + $0x10] sm:$0xff]  ;;  %v1578_v16 = vld [vmem:[#allocation9 + $0x18] sm:$0xff]  ;;  %s1381_s20 = smov [#allocation27]   ;;  %s882_s17 = sshll.u32 %s1679_s19, 4  ;;  %s883_s17 = int_to_ptr.hbm [resolvable:$true] %s882_s17 }
  0x47   :  { %327 = vmatpush.msra.mxu1 %v286_v5  ;;  %927 = vmatpush.msra.mxu2 %v286_v5  ;;  %v954_v20 = vld [vmem:[%s1666_s6] ss:$0 sm:$0xff]  ;;  %s880_s8 = sshll.u32 %s1381_s20, 4  ;;  %s1382_s18 = smov [#allocation24]   ;;  %s881_s8 = int_to_ptr.vmem [resolvable:$true] %s880_s8 }
  0x48   :  { %928 = vmatpush.msra.mxu3 %v286_v5  ;;  %280 = vmatpush.msra.mxu0 %v257_v6  ;;  %v955_v36 = vld [vmem:[%s1667_s7] ss:$0 sm:$0xff]  ;;  %s858_s24 = sshll.u32 %s1382_s18, 4  ;;  %s1689_s5 = sld [smem:[#allocation41_spill]]  ;;  %s859_s24 = int_to_ptr.vmem [resolvable:$true] %s858_s24 }
  0x49   :  { %328 = vmatpush.msra.mxu1 %v285_v7  ;;  %907 = vmatmul.msk.f32.vlgmr.msra.gmra.mxu0 %vm261_vm0, %v1546_v8 }
  0x4a   :  { %908 = vmatmul.msk.f32.vlgmr.msra.gmra.mxu1 %vm261_vm0, %v1548_v9  ;;  %929 = vmatpush.msra.mxu2 %v285_v7 }
  0x4b   :  { %930 = vmatpush.msra.mxu3 %v285_v7  ;;  %912 = vmatmul.msk.f32.vlgmr.msra.gmra.mxu2 %vm261_vm0, %v1550_v10 }
  0x4c   :  { %914 = vmatmul.msk.f32.vlgmr.msra.gmra.mxu3 %vm261_vm0, %v1552_v11 }
  0x4e   :  { %s860_s14 = sshll.u32 %s1689_s5, 4  ;;  %s861_s14 = int_to_ptr.hbm [resolvable:$true] %s860_s14 }
  0x52   :  { %909 = vmatmul.msk.f32.gmra.mxu1 %vm261_vm0, %v1562_v12 }
  0x53   :  { %913 = vmatmul.msk.f32.gmra.mxu2 %vm261_vm0, %v1564_v13 }
  0x54   :  { %915 = vmatmul.msk.f32.gmra.mxu3 %vm261_vm0, %v1566_v14 }
  0x5a   :  { %910 = vmatmul.msk.f32.gmra.mxu1 %vm261_vm0, %v1574_v15 }
  0x62   :  { %911 = vmatmul.msk.f32.gmra.mxu1 %vm261_vm0, %v1578_v16 }
  0xc6   :  { %v282_v17 = vpop.f32.mrf.mxu0 }
  0xc7   :  { %v330_v18 = vpop.f32.mrf.mxu1  ;;  %v362_v19 = vperm.slane %v282_v17, 0  ;;  %v355_v21 = vrot.slane %v282_v17, 1  ;;  %v358_v22 = vrot.slane %v282_v17, 4  ;;  %v360_v24 = vrot.slane %v282_v17, 6 }
  0xc8   :  { %v356_v33 = vrot.slane %v282_v17, 2  ;;  %v359_v34 = vrot.slane %v282_v17, 5  ;;  %v361_v50 = vrot.slane %v282_v17, 7  ;;  %v357_v54 = vrot.slane %v282_v17, 3 }
  0xc9   :  { %v378_v23 = vadd.f32 %v362_v19, %v330_v18  ;;  %v363_v26 = vperm.slane %v355_v21, 0  ;;  %v366_v27 = vperm.slane %v358_v22, 0  ;;  %v368_v28 = vperm.slane %v360_v24, 0 }
  0xca   :  { %v364_v41 = vperm.slane %v356_v33, 0  ;;  %v367_v42 = vperm.slane %v359_v34, 0  ;;  %v369_v57 = vperm.slane %v361_v50, 0  ;;  %v365_v61 = vperm.slane %v357_v54, 0 }
  0xcb   :  { %v390_v25 = vadd.f32 %v954_v20, %v378_v23 }
  0xcd   :  { %959 = vtanh.f32 %v390_v25 }
  0xce   :  { %v342_v30 = vpop.f32.mrf.mxu2 }
  0xcf   :  { %v333_v29 = vpop.f32.mrf.mxu1  ;;  %v382_v32 = vadd.f32 %v366_v27, %v342_v30  ;;  %v348_v35 = vpop.f32.mrf.mxu3 }
  0xd0   :  { %v379_v31 = vadd.f32 %v363_v26, %v333_v29  ;;  %v384_v39 = vadd.f32 %v368_v28, %v348_v35  ;;  %v451_v29 = vlaneseq }
  0xd1   :  { %v394_v38 = vadd.f32 %v954_v20, %v382_v32 }
  0xd2   :  { %v391_v37 = vadd.f32 %v954_v20, %v379_v31  ;;  %v396_v44 = vadd.f32 %v954_v20, %v384_v39  ;;  %v452_v33 = vand.u32 127, %v451_v29 }
  0xd3   :  { %v960_v40 = vpop.eup %959 }
  0xd4   :  { %961 = vtanh.f32 %v391_v37  ;;  %v410_v43 = vmul.f32 %v960_v40, %v955_v36 }
  0xd5   :  { %963 = vtanh.f32 %v394_v38 }
  0xd6   :  { %v345_v46 = vpop.f32.mrf.mxu2  ;;  %v418_v47 = vsel %vm261_vm0, %v410_v43, 0.0  ;;  %965 = vtanh.f32 %v396_v44 }
  0xd7   :  { %v336_v45 = vpop.f32.mrf.mxu1  ;;  %v383_v49 = vadd.f32 %v367_v42, %v345_v46  ;;  %419 = vadd.xlane.f32.xlu0 %v418_v47  ;;  %v351_v59 = vpop.f32.mrf.mxu3  ;;  %v256_v47 = vld [vmem:[#allocation10] sm:$0xff] }
  0xd8   :  { %v380_v48 = vadd.f32 %v364_v41, %v336_v45  ;;  %v385_v1 = vadd.f32 %v369_v57, %v351_v59  ;;  %vm442_vm8 = vcmp.eq.f32.partialorder %v256_v47, 0.0 }
  0xd9   :  { %v395_v53 = vadd.f32 %v954_v20, %v383_v49 }
  0xda   :  { %v962_v51 = vpop.eup %961  ;;  %v392_v52 = vadd.f32 %v954_v20, %v380_v48  ;;  %v397_v17 = vadd.f32 %v954_v20, %v385_v1  ;;  %v686_v1 = vld [vmem:[#allocation18 + $0x8] sm:$0xff] }
  0xdb   :  { %v964_v55 = vpop.eup %963  ;;  %v411_v56 = vmul.f32 %v962_v51, %v955_v36 }
  0xdc   :  { %967 = vtanh.f32 %v392_v52  ;;  %v414_v58 = vmul.f32 %v964_v55, %v955_v36  ;;  %v966_v0 = vpop.eup %965 }
  0xdd   :  { %969 = vtanh.f32 %v395_v53  ;;  %v421_v63 = vsel %vm261_vm0, %v411_v56, 0.0  ;;  %v416_v7 = vmul.f32 %v966_v0, %v955_v36  ;;  %v687_v0 = vld [vmem:[#allocation18 + $0x10] sm:$0xff] }
  0xde   :  { %v430_v60 = vsel %vm261_vm0, %v414_v58, 0.0 }
  0xdf   :  { %431 = vadd.xlane.f32.xlu2 %v430_v60  ;;  %v339_v62 = vpop.f32.mrf.mxu1  ;;  %422 = vadd.xlane.f32.xlu0 %v421_v63  ;;  %v436_v22 = vsel %vm261_vm0, %v416_v7, 0.0  ;;  %v688_v63 = vld [vmem:[#allocation18 + $0x18] sm:$0xff] }
  0xe0   :  { %v381_v2 = vadd.f32 %v365_v61, %v339_v62  ;;  %v492_v61 = vshrl.u32 %v451_v29, 7  ;;  %705 = vmatpush.msrb.mxu0 %v688_v63  ;;  %v633_v29 = vld [vmem:[#allocation16 + $0x10] sm:$0xff] }
  0xe2   :  { %v968_v3 = vpop.eup %967  ;;  %v393_v4 = vadd.f32 %v954_v20, %v381_v2  ;;  %953 = vset.pattern.permute.xlu0 %v492_v61  ;;  %952 = vset.pattern.permute.xlu2 %v492_v61 }
  0xe3   :  { %v970_v5 = vpop.eup %969  ;;  %v412_v6 = vmul.f32 %v968_v3, %v955_v36  ;;  %951 = vset.pattern.permute.xlu1 %v492_v61  ;;  %706 = vmatpush.msrb.mxu0 %v687_v0 }
  0xe4   :  { %971 = vtanh.f32 %v393_v4  ;;  %v415_v18 = vmul.f32 %v970_v5, %v955_v36  ;;  %v685_v4 = vld [vmem:[#allocation18] sm:$0xff] }
  0xe5   :  { %v424_v19 = vsel %vm261_vm0, %v412_v6, 0.0  ;;  %973 = vtanh.f32 %v397_v17  ;;  %707 = vmatpush.msrb.mxu0 %v686_v1 }
  0xe6   :  { %v433_v21 = vsel %vm261_vm0, %v415_v18, 0.0  ;;  %425 = vadd.xlane.f32.xlu1 %v424_v19 }
  0xe7   :  { %434 = vadd.xlane.f32.xlu2 %v433_v21  ;;  %437 = vadd.xlane.f32.xlu0 %v436_v22 }
  0xe8   :  { %708 = vmatpush.msrb.mxu0 %v685_v4 }
  0xe9   :  { %918 = vmatmul.msk.f32.vlgmr.msrb.gmra.mxu0 %vm261_vm0, %v1546_v8 }
  0xea   :  { %v972_v23 = vpop.eup %971 }
  0xeb   :  { %v413_v24 = vmul.f32 %v972_v23, %v955_v36  ;;  %v974_v26 = vpop.eup %973 }
  0xec   :  { %v417_v27 = vmul.f32 %v974_v26, %v955_v36 }
  0xed   :  { %v427_v25 = vsel %vm261_vm0, %v413_v24, 0.0 }
  0xee   :  { %428 = vadd.xlane.f32.xlu1 %v427_v25  ;;  %v439_v20 = vsel %vm261_vm0, %v417_v27, 0.0  ;;  %v634_v27 = vld [vmem:[#allocation16 + $0x18] sm:$0xff] }
  0xef   :  { %649 = vmatpush.msrb.mxu2 %v634_v27 }
  0xf1   :  { %650 = vmatpush.msrb.mxu2 %v633_v29 }
  0xf6   :  { %440 = vadd.xlane.f32.xlu1 %v439_v20  ;;  %v630_v20 = vld [vmem:[#allocation15 + $0x18] sm:$0xff] }
  0xf7   :  { %672 = vmatpush.msrb.mxu3 %v630_v20 }
 0x14a   :  { %v420_v28 = vpop.xlane.xlu0 %419 }
 0x14b   :  { %v453_v37 = vperm.slane %v420_v28, %v452_v33 }
 0x152   :  { %v432_v30 = vpop.xlane.xlu2 %431  ;;  %v423_v32 = vpop.xlane.xlu0 %422 }
 0x153   :  { %v454_v34 = vperm.slane %v423_v32, %v452_v33  ;;  %v457_v40 = vperm.slane %v432_v30, %v452_v33  ;;  %v629_v30 = vld [vmem:[#allocation15 + $0x10] sm:$0xff]  ;;  %v632_v32 = vld [vmem:[#allocation16 + $0x8] sm:$0xff] }
 0x154   :  { %673 = vmatpush.msrb.mxu3 %v629_v30  ;;  %651 = vmatpush.msrb.mxu2 %v632_v32 }
 0x155   :  { %v462_v39 = vsel %vm461_vm1, %v454_v34, %v453_v37  ;;  %v631_v37 = vld [vmem:[#allocation16] sm:$0xff] }
 0x156   :  { %652 = vmatpush.msrb.mxu2 %v631_v37 }
 0x159   :  { %v426_v31 = vpop.xlane.xlu1 %425 }
 0x15a   :  { %v455_v35 = vperm.slane %v426_v31, %v452_v33  ;;  %v435_v41 = vpop.xlane.xlu2 %434  ;;  %v438_v46 = vpop.xlane.xlu0 %437 }
 0x15b   :  { %v458_v45 = vperm.slane %v435_v41, %v452_v33  ;;  %v459_v49 = vperm.slane %v438_v46, %v452_v33 }
 0x15c   :  { %v464_v42 = vsel %vm463_vm2, %v455_v35, %v462_v39 }
 0x161   :  { %v429_v38 = vpop.xlane.xlu1 %428 }
 0x162   :  { %v456_v36 = vperm.slane %v429_v38, %v452_v33  ;;  %v627_v38 = vld [vmem:[#allocation15] sm:$0xff] }
 0x164   :  { %v466_v43 = vsel %vm465_vm3, %v456_v36, %v464_v42 }
 0x165   :  { %v468_v44 = vsel %vm467_vm4, %v457_v40, %v466_v43  ;;  %v246_v43 = vld [vmem:[#allocation4] sm:$0xff] }
 0x166   :  { %v470_v48 = vsel %vm469_vm5, %v458_v45, %v468_v44  ;;  %v770_v44 = vld [vmem:[#allocation21 + $0x18] sm:$0xff] }
 0x167   :  { %v472_v52 = vsel %vm471_vm6, %v459_v49, %v470_v48  ;;  %v765_v45 = vld [vmem:[#allocation19 + $0x18] sm:$0xff]  ;;  %787 = vmatpush.msra.mxu2 %v770_v44  ;;  %v769_v48 = vld [vmem:[#allocation21 + $0x10] sm:$0xff] }
 0x169   :  { %v441_v50 = vpop.xlane.xlu1 %440  ;;  %788 = vmatpush.msra.mxu2 %v769_v48 }
 0x16a   :  { %v460_v51 = vperm.slane %v441_v50, %v452_v33  ;;  %v628_v33 = vld [vmem:[#allocation15 + $0x8] sm:$0xff] }
 0x16b   :  { %674 = vmatpush.msrb.mxu3 %v628_v33 }
 0x16c   :  { %v474_v53 = vsel %vm473_vm7, %v460_v51, %v472_v52 }
 0x16d   :  { %v476_v54 = vsel %vm442_vm8, -1e+10, %v474_v53  ;;  %675 = vmatpush.msrb.mxu3 %v627_v38  ;;  %v763_v53 = vld [vmem:[#allocation19 + $0x8] sm:$0xff] }
 0x16e   :  { %v478_v55 = vsel %vm477_vm9, %v476_v54, -inf  ;;  %917 = vmatmul.msk.f32.vlgmr.msrb.gmra.mxu3 %vm261_vm0, %v246_v43 }
 0x16f   :  { %479 = vmax.xlane.f32.xlu2 %v478_v55  ;;  %810 = vmatpush.msra.mxu3 %v765_v45 }
 0x1e2   :  { %v480_v56 = vpop.xlane.xlu2 %479 }
 0x1e3   :  { %v481_v57 = vsub.f32 %v476_v54, %v480_v56  ;;  %v767_v56 = vld [vmem:[#allocation21] sm:$0xff] }
 0x1e5   :  { %v482_v58 = vmul.f32 1.442695, %v481_v57 }
 0x1e7   :  { %975 = vpow2.f32 %v482_v58  ;;  %v762_v58 = vld [vmem:[#allocation19] sm:$0xff] }
 0x1ed   :  { %v976_v59 = vpop.eup %975 }
 0x1ee   :  { %v484_v60 = vsel %vm477_vm9, %v976_v59, 0.0 }
 0x1ef   :  { %485 = vadd.xlane.f32.xlu0 %v484_v60 }
 0x262   :  { %v486_v62 = vpop.xlane.xlu0 %485 }
 0x263   :  { %977 = vrcp.f32 %v486_v62 }
 0x269   :  { %v978_v2 = vpop.eup %977 }
 0x26a   :  { %v488_v3 = vmul.f32 %v978_v2, %v976_v59  ;;  %v956_v2 = vld [vmem:[%s1672_s12] ss:$0 sm:$0xff]  ;;  %s1378_s12 = smov 32  }
 0x26c   :  { %489 = vst.msk [vmem:[#allocation27] sm:$0xff] %vm477_vm9, %v488_v3  ;;  %v504_v5 = vperm.slane %v488_v3, 2  ;;  %v497_v6 = vperm.slane %v488_v3, 1  ;;  %v490_v7 = vperm.slane %v488_v3, 0  ;;  %v511_v17 = vperm.slane %v488_v3, 3 }
 0x26d   :  { %v518_v18 = vperm.slane %v488_v3, 4  ;;  %v525_v19 = vperm.slane %v488_v3, 5  ;;  %v532_v21 = vperm.slane %v488_v3, 6  ;;  %v539_v22 = vperm.slane %v488_v3, 7 }
 0x26e   :  { %509 = vperm.xlu0 %953, %v504_v5   ;;  %502 = vperm.xlu2 %952, %v497_v6   ;;  %v710_v6 = vpop.f32.mrf.mxu0 }
 0x26f   :  { %495 = vperm.xlu1 %951, %v490_v7  }
 0x276   :  { %516 = vperm.xlu2 %952, %v511_v17  }
 0x277   :  { %523 = vperm.xlu1 %951, %v518_v18   ;;  %v711_v18 = vadd.f32 %v956_v2, %v710_v6 }
 0x27e   :  { %530 = vperm.xlu2 %952, %v525_v19  }
 0x27f   :  { %537 = vperm.xlu1 %951, %v532_v21  }
 0x286   :  { %544 = vperm.xlu2 %952, %v539_v22  }
 0x287   :  { %734 = vrot.lane.b32.xlu1 %v711_v18, %s1377_s26 }
 0x28f   :  { %750 = vrot.lane.b32.xlu1 %v1546_v8, %s1378_s12 }
 0x2c8   :  { %v503_v23 = vpop.permute.xlu2 %502 }
 0x2c9   :  { %v547_v26 = vmul.f32 %v503_v23, %v1562_v12 }
 0x2cb   :  { %v561_v28 = vsel %vm261_vm0, %v547_v26, 0.0 }
 0x2cc   :  { %v562_v34 = vrot.slane %v561_v28, 4 }
 0x2ce   :  { %v563_v46 = vadd.f32 %v562_v34, %v561_v28 }
 0x2d0   :  { %v517_v24 = vpop.permute.xlu2 %516  ;;  %v564_v57 = vrot.slane %v563_v46, 2 }
 0x2d1   :  { %v549_v31 = vmul.f32 %v517_v24, %v1578_v16 }
 0x2d2   :  { %v565_v3 = vadd.f32 %v564_v57, %v563_v46 }
 0x2d3   :  { %v575_v41 = vsel %vm261_vm0, %v549_v31, 0.0 }
 0x2d4   :  { %v576_v51 = vrot.slane %v575_v41, 4  ;;  %v566_v23 = vrot.slane %v565_v3, 1 }
 0x2d6   :  { %v577_v62 = vadd.f32 %v576_v51, %v575_v41  ;;  %v567_v32 = vadd.f32 %v566_v23, %v565_v3 }
 0x2d8   :  { %v531_v25 = vpop.permute.xlu2 %530  ;;  %v578_v19 = vrot.slane %v577_v62, 2 }
 0x2d9   :  { %v551_v16 = vmul.f32 %v531_v25, %v1564_v13  ;;  %v768_v13 = vld [vmem:[#allocation21 + $0x8] sm:$0xff] }
 0x2da   :  { %789 = vmatpush.msra.mxu2 %v768_v13  ;;  %v579_v20 = vadd.f32 %v578_v19, %v577_v62 }
 0x2db   :  { %v589_v54 = vsel %vm261_vm0, %v551_v16, 0.0 }
 0x2dc   :  { %v590_v63 = vrot.slane %v589_v54, 4  ;;  %790 = vmatpush.msra.mxu2 %v767_v56 }
 0x2de   :  { %v591_v21 = vadd.f32 %v590_v63, %v589_v54  ;;  %v957_v54 = vld [vmem:[%s1671_s11] ss:$0 sm:$0xff]  ;;  %s1379_s11 = smov 96  }
 0x2e0   :  { %v510_v35 = vpop.permute.xlu0 %509  ;;  %v545_v36 = vpop.permute.xlu2 %544  ;;  %v592_v28 = vrot.slane %v591_v21, 2 }
 0x2e1   :  { %v548_v12 = vmul.f32 %v510_v35, %v1574_v15  ;;  %v496_v39 = vpop.permute.xlu1 %495  ;;  %v553_v49 = vmul.f32 %v545_v36, %v1566_v14 }
 0x2e2   :  { %v546_v40 = vmul.f32 %v496_v39, %v1548_v9  ;;  %v764_v9 = vld [vmem:[#allocation19 + $0x10] sm:$0xff]  ;;  %v593_v39 = vadd.f32 %v592_v28, %v591_v21  ;;  %v820_v28 = vld [vmem:[#allocation22 + $0x8] sm:$0xff] }
 0x2e3   :  { %v568_v42 = vsel %vm261_vm0, %v548_v12, 0.0  ;;  %811 = vmatpush.msra.mxu3 %v764_v9  ;;  %v603_v60 = vsel %vm261_vm0, %v553_v49, 0.0  ;;  %v580_v12 = vrot.slane %v579_v20, 1 }
 0x2e4   :  { %v569_v47 = vrot.slane %v568_v42, 4  ;;  %v554_v15 = vsel %vm261_vm0, %v546_v40, 0.0  ;;  %v604_v4 = vrot.slane %v603_v60, 4  ;;  %v594_v44 = vrot.slane %v593_v39, 1 }
 0x2e5   :  { %v555_v50 = vrot.slane %v554_v15, 4  ;;  %812 = vmatpush.msra.mxu3 %v763_v53  ;;  %v677_v53 = vpop.f32.mrf.mxu3 }
 0x2e6   :  { %v570_v52 = vadd.f32 %v569_v47, %v568_v42  ;;  %v605_v24 = vadd.f32 %v604_v4, %v603_v60  ;;  %v595_v9 = vadd.f32 %v594_v44, %v593_v39 }
 0x2e7   :  { %v556_v55 = vadd.f32 %v555_v50, %v554_v15  ;;  %813 = vmatpush.msra.mxu3 %v762_v58 }
 0x2e8   :  { %v571_v59 = vrot.slane %v570_v52, 2  ;;  %921 = vmatmul.msk.f32.vlgmr.msra.gmra.mxu3 %vm261_vm0, %v246_v43  ;;  %v606_v33 = vrot.slane %v605_v24, 2  ;;  %v581_v43 = vadd.f32 %v580_v12, %v579_v20  ;;  %v821_v20 = vld [vmem:[#allocation22 + $0x10] sm:$0xff] }
 0x2e9   :  { %v557_v61 = vrot.slane %v556_v55, 2  ;;  %v524_v14 = vpop.permute.xlu1 %523 }
 0x2ea   :  { %v550_v0 = vmul.f32 %v524_v14, %v1550_v10  ;;  %v572_v7 = vadd.f32 %v571_v59, %v570_v52  ;;  %v607_v41 = vadd.f32 %v606_v33, %v605_v24 }
 0x2eb   :  { %v558_v1 = vadd.f32 %v557_v61, %v556_v55 }
 0x2ec   :  { %v582_v5 = vsel %vm261_vm0, %v550_v0, 0.0  ;;  %v573_v25 = vrot.slane %v572_v7, 1  ;;  %v608_v46 = vrot.slane %v607_v41, 1 }
 0x2ed   :  { %v583_v17 = vrot.slane %v582_v5, 4  ;;  %v559_v10 = vrot.slane %v558_v1, 1 }
 0x2ee   :  { %v574_v35 = vadd.f32 %v573_v25, %v572_v7  ;;  %v609_v50 = vadd.f32 %v608_v46, %v607_v41 }
 0x2ef   :  { %v584_v22 = vadd.f32 %v583_v17, %v582_v5  ;;  %v560_v29 = vadd.f32 %v559_v10, %v558_v1 }
 0x2f1   :  { %v585_v26 = vrot.slane %v584_v22, 2  ;;  %v538_v27 = vpop.permute.xlu1 %537  ;;  %v618_v36 = vsel %vm461_vm1, %v567_v32, %v560_v29  ;;  %v819_v29 = vld [vmem:[#allocation22] sm:$0xff] }
 0x2f2   :  { %v552_v30 = vmul.f32 %v538_v27, %v1552_v11  ;;  %v619_v16 = vsel %vm463_vm2, %v574_v35, %v618_v36  ;;  %v822_v27 = vld [vmem:[#allocation22 + $0x18] sm:$0xff] }
 0x2f3   :  { %v586_v31 = vadd.f32 %v585_v26, %v584_v22  ;;  %v620_v47 = vsel %vm465_vm3, %v581_v43, %v619_v16  ;;  %838 = vmatpush.msra.mxu0 %v822_v27  ;;  %v958_v35 = vld [vmem:[%s1676_s16] ss:$0 sm:$0xff] }
 0x2f4   :  { %v596_v34 = vsel %vm261_vm0, %v552_v30, 0.0 }
 0x2f5   :  { %v587_v37 = vrot.slane %v586_v31, 1  ;;  %v597_v38 = vrot.slane %v596_v34, 4  ;;  %839 = vmatpush.msra.mxu0 %v821_v20 }
 0x2f7   :  { %v598_v40 = vadd.f32 %v597_v38, %v596_v34  ;;  %v588_v11 = vadd.f32 %v587_v37, %v586_v31  ;;  %840 = vmatpush.msra.mxu0 %v820_v28 }
 0x2f9   :  { %v599_v42 = vrot.slane %v598_v40, 2  ;;  %v621_v48 = vsel %vm467_vm4, %v588_v11, %v620_v47  ;;  %v735_v6 = vpop.permute.xlu1 %734  ;;  %841 = vmatpush.msra.mxu0 %v819_v29 }
 0x2fa   :  { %v622_v13 = vsel %vm469_vm5, %v595_v9, %v621_v48 }
 0x2fb   :  { %v600_v45 = vadd.f32 %v599_v42, %v598_v40 }
 0x2fd   :  { %v601_v15 = vrot.slane %v600_v45, 1 }
 0x2ff   :  { %v602_v49 = vadd.f32 %v601_v15, %v600_v45 }
 0x301   :  { %v623_v8 = vsel %vm471_vm6, %v602_v49, %v622_v13  ;;  %v751_v10 = vpop.permute.xlu1 %750 }
 0x302   :  { %v624_v51 = vsel %vm473_vm7, %v609_v50, %v623_v8 }
 0x303   :  { %626 = vst.msk [vmem:[#allocation2] sm:$0xff] %vm261_vm0, %v624_v51  ;;  %916 = vmatmul.msk.f32.vlgmr.msrb.gmra.mxu2 %vm261_vm0, %v624_v51 }
 0x30a   :  { %v766_v52 = vld [vmem:[#allocation2] sm:$0xff] }
 0x30b   :  { %920 = vmatmul.msk.f32.vlgmr.msra.gmra.mxu2 %vm261_vm0, %v766_v52 }
 0x36b   :  { %v815_v33 = vpop.f32.mrf.mxu3 }
 0x386   :  { %v654_v55 = vpop.f32.mrf.mxu2 }
 0x387   :  { %v678_v56 = vadd.f32 %v677_v53, %v654_v55 }
 0x389   :  { %v684_v57 = vadd.f32 %v957_v54, %v678_v56 }
 0x38b   :  { %v713_v58 = vadd.f32 %v711_v18, %v684_v57 }
 0x38d   :  { %v919_v59 = vmul.f32 -1.442695, %v713_v58 }
 0x38e   :  { %v792_v32 = vpop.f32.mrf.mxu2 }
 0x38f   :  { %979 = vpow2.f32 %v919_v59  ;;  %v816_v34 = vadd.f32 %v815_v33, %v792_v32 }
 0x395   :  { %v980_v60 = vpop.eup %979 }
 0x396   :  { %v717_v61 = vadd.f32 1.0, %v980_v60 }
 0x398   :  { %981 = vrcp.f32 %v717_v61  ;;  %v729_v0 = vand.u32 2147483648, %v717_v61  ;;  %v727_v2 = vand.u32 2147483647, %v717_v61  ;;  %vm723_vm11 = vweird.f32 %v717_v61 }
 0x39a   :  { %v730_v4 = vor.u32 1.1754944e-38, %v729_v0  ;;  %vm728_vm13 = vcmp.eq.f32.partialorder %v727_v2, 8.507059e+37 }
 0x39e   :  { %v982_v14 = vpop.eup %981 }
 0x39f   :  { %v719_v62 = vmul.f32 %v982_v14, %v717_v61  ;;  %vm724_vm10 = vweird.f32 %v982_v14 }
 0x3a0   :  { %vm725_vm12 = vmor %vm723_vm11, %vm724_vm10 }
 0x3a1   :  { %v720_v63 = vsub.f32 1.0, %v719_v62 }
 0x3a3   :  { %v721_v1 = vmul.f32 %v982_v14, %v720_v63 }
 0x3a5   :  { %v722_v3 = vadd.f32 %v982_v14, %v721_v1 }
 0x3a7   :  { %v726_v5 = vsel %vm725_vm12, %v982_v14, %v722_v3 }
 0x3a8   :  { %v731_v7 = vsel %vm728_vm13, %v730_v4, %v726_v5 }
 0x3a9   :  { %v737_v17 = vmul.f32 %v735_v6, %v731_v7  ;;  %v744_v22 = vsub.f32 1.0, %v731_v7  ;;  %v753_v24 = vmul.f32 %v751_v10, %v731_v7 }
 0x3ab   :  { %739 = vrot.lane.b32.xlu0 %v737_v17, %s1377_s26 }
 0x41d   :  { %v740_v18 = vpop.permute.xlu0 %739 }
 0x41e   :  { %v742_v19 = vadd.f32 %v740_v18, %v684_v57 }
 0x420   :  { %983 = vtanh.f32 %v742_v19 }
 0x426   :  { %v984_v21 = vpop.eup %983 }
 0x427   :  { %746 = vrot.lane.b32.xlu2 %v984_v21, %s1379_s11 }
 0x481   :  { %v747_v23 = vpop.permute.xlu2 %746 }
 0x482   :  { %v749_v25 = vmul.f32 %v747_v23, %v744_v22 }
 0x484   :  { %v754_v26 = vadd.f32 %v753_v24, %v749_v25 }
 0x486   :  { %756 = vrot.lane.b32.xlu0 %v754_v26, %s1379_s11 }
 0x4f8   :  { %v757_v30 = vpop.permute.xlu0 %756 }
 0x4f9   :  { %759 = vst.msk [vmem:[#allocation3] sm:$0xff] %vm261_vm0, %v757_v30 }
 0x4fa   :  { %760 = vst.msk [vmem:[#allocation25] sm:$0xff] %vm261_vm0, %v757_v30 }
 0x4fb   :  { %874 = dma.vmem_to_hbm [thread:$0]  %s870_s27, 128, %s872_s30, [#allocation26]  }
 0x4fc   :  { %885 = dma.vmem_to_hbm [thread:$0]  %s881_s8, 128, %s883_s17, [#allocation26]  }
 0x500   :  { %v818_v31 = vld [vmem:[#allocation3] sm:$0xff] }
 0x501   :  { %922 = vmatmul.msk.f32.vlgmr.msra.gmra.mxu0 %vm261_vm0, %v818_v31 }
 0x57e   :  { %v843_v37 = vpop.f32.mrf.mxu0 }
 0x57f   :  { %v846_v38 = vadd.f32 %v843_v37, %v816_v34 }
 0x581   :  { %v851_v12 = vadd.f32 %v958_v35, %v846_v38 }
 0x583   :  { %852 = vst [vmem:[#allocation24] sm:$0xff] %v851_v12 }
 0x584   :  { %863 = dma.vmem_to_hbm [thread:$0]  %s859_s24, 128, %s861_s14, [#allocation6]  }
 0x585   :  { %1359 = dma.done.wait [#allocation6], 128  }
 0x586   :  { %1360 = vsyncadd [#allocation6], 4294967168 }
 0x587   :  { %1361 = dma.done.wait [#allocation26], 256  }
 0x588   :  { %1362 = vsyncadd [#allocation26], 4294967040 }
 0x589   :  { %898 = vsyncpa [#allocation5], 1 }
 0x58a   :  { %899 = vsyncpa [#allocation8], 1 }
 0x58b   :  { %900 = vsyncpa [#allocation11], 1 }
 0x58c   :  { %901 = vsyncpa [#allocation14], 1 }
 0x58d   :  { %902 = vsyncpa [#allocation17], 1 }
 0x58e   :  { %903 = vsyncpa [#allocation20], 1 }
 0x58f   :  { %904 = vsyncpa [#allocation23], 1 }
 0x590   :  { %905 = vsyncpa [#allocation6], 1 }
 0x591   :  { %906 = vsyncpa [#allocation26], 1 }

</bundles_post_ra>
